<compile_context>
chip_gen: v7x
topology: tpu7x:2x2x1
jax: 0.10.0
libtpu: 0.0.40
codegen_flags: <defaults>
</compile_context>

<pallas_src>
import functools
import math

import jax
import jax.numpy as jnp
from jax import lax
from jax.experimental import pallas as pl
from jax.experimental.pallas import tpu as pltpu

_INV_SQRT2 = 0.7071067811865476


# --------------------------------------------------------------------------
# Stage 1: per-(batch, s-tile, relation) source/target projections.
# --------------------------------------------------------------------------
def _proj_kernel(x_ref, wcatT_ref, bcat_ref, acat_ref, bsrc_ref, btgt_ref,
                 sproj_ref, tproj_ref, base_ref, *, hidden, rank, rank_matmul):
    """grid = (B, S/TSP, L).

    x_ref     : (1, TSP, H)    hidden-state rows for (batch b, s-tile i)
    wcatT_ref : (H, 2H)        [Ws^T | Wt^T]
    bcat_ref  : (1, 2H)        [bs | bt]
    acat_ref  : (1, H, 2r)     [A_src[l] | A_tgt[l]]
    bsrc_ref  : (1, r, H)      B_src[l]
    btgt_ref  : (1, r, H)      B_tgt[l]
    sproj_ref, tproj_ref : (1, 1, TSP, H) outputs
    base_ref  : (TSP, 2H)      VMEM scratch; persists across the L axis

    CORRECTNESS GUARD: the base projection cached in `base_ref` at l == 0 is
    reused for l > 0.  This relies on L being the LAST grid axis (innermost,
    sequentially iterated) and marked "arbitrary" in dimension_semantics.
    Do NOT reorder the grid or mark the L axis "parallel".
    """
    l = pl.program_id(2)
    x = x_ref[0]                                               # (TSP, H)

    # One concatenated base matmul per (b, s-tile), reused across all L.
    @pl.when(l == 0)
    def _():
        base_ref[...] = (jnp.dot(x, wcatT_ref[...],
                                 preferred_element_type=jnp.float32)
                         + bcat_ref[...])

    # LoRA down-projection: full-K (H) matmul, src/tgt concatenated (N = 2r).
    xa = jnp.dot(x, acat_ref[0], preferred_element_type=jnp.float32)  # (TSP, 2r)

    b_s = bsrc_ref[0]                                          # (r, H)
    b_t = btgt_ref[0]                                          # (r, H)
    if rank_matmul:
        # Large rank: rank expansion stays on the MXU.
        d_s = jnp.dot(xa[:, :rank], b_s, preferred_element_type=jnp.float32)
        d_t = jnp.dot(xa[:, rank:], b_t, preferred_element_type=jnp.float32)
    else:
        # Small rank: a K=r matmul uses <= r/256 of the MXU systolic depth, so
        # do the rank expansion as r VPU broadcast-multiply-accumulates.
        d_s = xa[:, 0:1] * b_s[0, :]
        d_t = xa[:, rank:rank + 1] * b_t[0, :]
        for k in range(1, rank):
            d_s = d_s + xa[:, k:k + 1] * b_s[k, :]
            d_t = d_t + xa[:, rank + k:rank + k + 1] * b_t[k, :]

    # TODO(synk): emitting sproj/tproj in bf16 would halve stage-1 HBM writes
    # and stage-2 reads, but is a numerics change vs the f32 reference.
    sproj_ref[0, 0] = base_ref[:, :hidden] + d_s
    tproj_ref[0, 0] = base_ref[:, hidden:] + d_t


# --------------------------------------------------------------------------
# Stage 2: tiled pairwise GELU + classifier contraction, H-chunked reduction.
# --------------------------------------------------------------------------
def _pair_kernel(sproj_ref, tproj_ref, cls_ref, out_ref, *, hc, n_chunks, unroll):
    """grid = (B, L, S/TS, S/TT).  One step -> one (TS, TT) logits tile.

    sproj_ref : (1, 1, TS, H)   source projections for (b, l, src tile)
    tproj_ref : (1, 1, TT, H)   target projections for (b, l, tgt tile)
    cls_ref   : (1, 1, H)       0.5 * classifier column for relation l
    out_ref   : (1, 1, TS, TT)

    The H reduction is chunked so only a (TS, TT, hc) intermediate is live.
    The output block itself (VMEM) is the accumulator.
    """
    if n_chunks == 1:
        s = sproj_ref[0, 0]                                    # (TS, H)
        t = tproj_ref[0, 0]                                    # (TT, H)
        pair = s[:, None, :] + t[None, :, :]                   # (TS, TT, H)
        # exact GELU (nn.GELU default); the 0.5 factor is folded into cls_ref.
        g = pair * (1.0 + lax.erf(pair * _INV_SQRT2))
        out_ref[0, 0] = jnp.sum(g * cls_ref[0, 0], axis=-1)
        return

    ts = sproj_ref.shape[2]
    tt = tproj_ref.shape[2]
    out_ref[0, 0] = jnp.zeros((ts, tt), jnp.float32)

    def body(c, carry):
        off = pl.multiple_of(c * hc, hc)                       # hc is 128/256
        s = sproj_ref[0, 0, :, pl.ds(off, hc)]                 # (TS, hc)
        t = tproj_ref[0, 0, :, pl.ds(off, hc)]                 # (TT, hc)
        cl = cls_ref[0, 0, pl.ds(off, hc)]                     # (hc,)
        pair = s[:, None, :] + t[None, :, :]                   # (TS, TT, hc)
        g = pair * (1.0 + lax.erf(pair * _INV_SQRT2))
        # TODO(synk): storing tproj as (B, L, H, S) would move the reduce off
        # the XLU; only worth it if the bundle shows the XLU binding.
        out_ref[0, 0] += jnp.sum(g * cl, axis=-1)
        return carry

    lax.fori_loop(0, n_chunks, body, 0, unroll=unroll)


# --------------------------------------------------------------------------
# Tile / budget helpers.
# --------------------------------------------------------------------------
def _round_up(n, q):
    return ((n + q - 1) // q) * q


def _divisors_desc(n, quantum, cap):
    """Multiples of `quantum` <= cap that divide n, descending."""
    out = []
    t = (min(cap, n) // quantum) * quantum
    while t >= quantum:
        if n % t == 0:
            out.append(t)
        t -= quantum
    return out


def _pick_tile(n, cap, quantum):
    cands = _divisors_desc(n, quantum, cap)
    return cands[0] if cands else n


def _vmem_budget_bytes():
    """Generation-aware VMEM budget (v7x: 64 MiB physical; v5e/v6e: 128 MiB)."""
    cap = 64 * 1024 * 1024
    try:
        info = pltpu.get_tpu_info()
        cap = int(getattr(info, "vmem_capacity_bytes", cap))
    except Exception:
        pass
    return max(int(cap * 0.75), 16 * 1024 * 1024)


# --------------------------------------------------------------------------
# Wrapper.
# --------------------------------------------------------------------------
def kwja_heads_forward(x, params, *, ts_cap=128, tt_cap=256, tsp_cap=256):
    """x: (B, S, H) float32 -> relation_logits: (B, L, S, S) float32."""
    B, S, H = x.shape
    H2, L = params["cls"].shape
    assert H2 == H
    r = params["a_src"].shape[1]

    budget = _vmem_budget_bytes()

    # ---- pad S so stage-2 output stores stay lane-dense for ragged S -------
    S_pad = _round_up(S, 128) if S >= 128 else S
    x_p = x if S_pad == S else jnp.pad(x, ((0, 0), (0, S_pad - S), (0, 0)))

    # ---- parameter layout plumbing only (no compute hoisted out of Pallas) --
    wcatT = jnp.concatenate([params["ws"].T, params["wt"].T], axis=1)  # (H, 2H)
    bcat = jnp.concatenate([params["bs"], params["bt"]]).reshape(1, 2 * H)
    a_src = jnp.transpose(params["a_src"], (2, 0, 1))                  # (L, H, r)
    a_tgt = jnp.transpose(params["a_tgt"], (2, 0, 1))                  # (L, H, r)
    a_cat = jnp.concatenate([a_src, a_tgt], axis=2)                    # (L, H, 2r)
    b_src = jnp.transpose(params["b_src"], (2, 0, 1))                  # (L, r, H)
    b_tgt = jnp.transpose(params["b_tgt"], (2, 0, 1))                  # (L, r, H)
    # Fold GELU's 0.5 into the classifier column (saves one VPU mul / element).
    cls_half = (0.5 * params["cls"].T).reshape(L, 1, H)                # (L, 1, H)

    # ---- stage 1 tile (s-rows); keep weights + buffers inside the budget ---
    tsp_cands = _divisors_desc(S_pad, 8, min(tsp_cap, S_pad)) or [S_pad]

    def est1(tsp):
        w = 2 * H * 2 * H * 4                      # wcatT (double-buffered)
        xb = 2 * tsp * H * 4                       # x tile
        outs = 2 * 2 * tsp * H * 4                 # sproj/tproj tiles
        scr = tsp * 2 * H * 4                      # base scratch
        lora = 2 * (H * 2 * r + 2 * r * H * 2) * 4
        return w + xb + outs + scr + lora + 4 * 2 * H * 4

    TSP = tsp_cands[-1]
    for cand in tsp_cands:
        if est1(cand) <= int(budget * 0.85):
            TSP = cand
            break
    # TODO(synk): for very large H the (H, 2H) weight alone may not fit the
    # budget; would need to tile W^T over output columns as well.

    proj_kernel = functools.partial(_proj_kernel, hidden=H, rank=r,
                                    rank_matmul=(r > 8))
    sproj, tproj = pl.pallas_call(
        proj_kernel,
        out_shape=(jax.ShapeDtypeStruct((B, L, S_pad, H), jnp.float32),
                   jax.ShapeDtypeStruct((B, L, S_pad, H), jnp.float32)),
        grid=(B, S_pad // TSP, L),
        in_specs=[
            pl.BlockSpec((1, TSP, H), lambda b, i, l: (b, i, 0)),     # x
            pl.BlockSpec((H, 2 * H), lambda b, i, l: (0, 0)),         # [Ws^T|Wt^T]
            pl.BlockSpec((1, 2 * H), lambda b, i, l: (0, 0)),         # [bs|bt]
            pl.BlockSpec((1, H, 2 * r), lambda b, i, l: (l, 0, 0)),   # [A_s|A_t][l]
            pl.BlockSpec((1, r, H), lambda b, i, l: (l, 0, 0)),       # B_src[l]
            pl.BlockSpec((1, r, H), lambda b, i, l: (l, 0, 0)),       # B_tgt[l]
        ],
        out_specs=(pl.BlockSpec((1, 1, TSP, H), lambda b, i, l: (b, l, i, 0)),
                   pl.BlockSpec((1, 1, TSP, H), lambda b, i, l: (b, l, i, 0))),
        scratch_shapes=[pltpu.VMEM((TSP, 2 * H), jnp.float32)],       # base cache
        # L MUST stay last + "arbitrary" (base cache correctness, see kernel).
        compiler_params=pltpu.CompilerParams(
            dimension_semantics=("parallel", "parallel", "arbitrary"),
            vmem_limit_bytes=budget),
    )(x_p, wcatT, bcat, a_cat, b_src, b_tgt)

    # ---- stage 2 tiles: H-chunk + biggest (TS, TT) that fits the budget ----
    hc = H
    for c in (128, 256):
        if H > c and H % c == 0:
            hc = c
            break
    n_chunks = H // hc

    TT = _pick_tile(S_pad, tt_cap, 128)    # lane axis -> dense stores
    ts_cands = _divisors_desc(S_pad, 8, min(ts_cap, S_pad)) or [S_pad]

    def est2(ts):
        temps = 3 * ts * TT * hc * 4       # chunked pair/GELU/product chain
        tiles = 2 * (ts + TT) * H * 4      # double-buffered in tiles
        outs = 2 * ts * TT * 4
        return temps + tiles + outs + 4 * H * 4

    TS = ts_cands[-1]
    for cand in ts_cands:
        if est2(cand) <= int(budget * 0.85):
            TS = cand
            break

    pair_kernel = functools.partial(_pair_kernel, hc=hc, n_chunks=n_chunks,
                                    unroll=(n_chunks <= 8))
    out = pl.pallas_call(
        pair_kernel,
        out_shape=jax.ShapeDtypeStruct((B, L, S_pad, S_pad), jnp.float32),
        # target tiles innermost: the sproj tile's block index is unchanged
        # across the inner axis, so it stays resident in VMEM.
        grid=(B, L, S_pad // TS, S_pad // TT),
        in_specs=[
            pl.BlockSpec((1, 1, TS, H), lambda b, l, i, j: (b, l, i, 0)),
            pl.BlockSpec((1, 1, TT, H), lambda b, l, i, j: (b, l, j, 0)),
            pl.BlockSpec((1, 1, H), lambda b, l, i, j: (l, 0, 0)),
        ],
        out_specs=pl.BlockSpec((1, 1, TS, TT), lambda b, l, i, j: (b, l, i, j)),
        compiler_params=pltpu.CompilerParams(
            dimension_semantics=("parallel", "parallel", "parallel", "parallel"),
            vmem_limit_bytes=budget),
    )(sproj, tproj, cls_half)

    if S_pad != S:
        out = out[:, :, :S, :S]
    return out


# --------------------------------------------------------------------------
# Pure-JAX reference (mirrors the PyTorch forward in eval mode).
# --------------------------------------------------------------------------
def kwja_heads_reference(x, params):
    hs = x @ params["ws"].T + params["bs"]
    ht = x @ params["wt"].T + params["bt"]
    d_s = jnp.einsum("hrl,ril->hil", params["a_src"], params["b_src"])
    d_t = jnp.einsum("hrl,ril->hil", params["a_tgt"], params["b_tgt"])
    ds_out = jnp.einsum("bsh,hil->bsli", x, d_s)
    dt_out = jnp.einsum("bsh,hil->bsli", x, d_t)
    so = hs[:, :, None, :] + ds_out                            # (B, S, L, H)
    to = ht[:, :, None, :] + dt_out
    hidden = jax.nn.gelu(so[:, :, None] + to[:, None], approximate=False)  # (B,S,T,L,H)
    out = jnp.einsum("bstlh,hl->bstl", hidden, params["cls"])
    return jnp.transpose(out, (0, 3, 1, 2))                    # (B, L, S, T)


def init_params(key, hidden_size, num_relations, rank):
    ks = jax.random.split(key, 9)
    bound = 1.0 / math.sqrt(hidden_size)

    def u(k, shape, b=bound):
        return jax.random.uniform(k, shape, jnp.float32, -b, b)

    return dict(
        ws=u(ks[0], (hidden_size, hidden_size)),
        bs=u(ks[1], (hidden_size,)),
        wt=u(ks[2], (hidden_size, hidden_size)),
        bt=u(ks[3], (hidden_size,)),
        a_src=u(ks[4], (hidden_size, rank, num_relations)),
        b_src=u(ks[5], (rank, hidden_size, num_relations)),
        a_tgt=u(ks[6], (hidden_size, rank, num_relations)),
        b_tgt=u(ks[7], (rank, hidden_size, num_relations)),
        cls=u(ks[8], (hidden_size, num_relations)),
    )


if __name__ == "__main__":
    B, S, H, L, RANK = 2, 8, 32, 4, 2

    key = jax.random.PRNGKey(0)
    k_x, k_p = jax.random.split(key)
    x = jax.random.normal(k_x, (B, S, H), dtype=jnp.float32)
    params = init_params(k_p, hidden_size=H, num_relations=L, rank=RANK)

    out = kwja_heads_forward(x, params)
    out = jax.block_until_ready(out)

    ref = jax.block_until_ready(kwja_heads_reference(x, params))
    assert out.shape == (B, L, S, S), out.shape
    err = float(jnp.max(jnp.abs(out - ref)))
    assert jnp.allclose(out, ref, rtol=1e-3, atol=1e-3), err

    print("KERNEL_OK")
</pallas_src>

<mosaic_0001>
module attributes {stable_mosaic.version = 11 : i64} {
  func.func @_proj_kernel(%arg0: i32, %arg1: i32, %arg2: i32, %arg3: memref<1x8x32xf32, #tpu.memory_space<vmem>>, %arg4: memref<32x64xf32, #tpu.memory_space<vmem>>, %arg5: memref<1x64xf32, #tpu.memory_space<vmem>>, %arg6: memref<1x32x4xf32, #tpu.memory_space<vmem>>, %arg7: memref<1x2x32xf32, #tpu.memory_space<vmem>>, %arg8: memref<1x2x32xf32, #tpu.memory_space<vmem>>, %arg9: memref<1x1x8x32xf32, #tpu.memory_space<vmem>>, %arg10: memref<1x1x8x32xf32, #tpu.memory_space<vmem>>, %arg11: memref<8x64xf32, #tpu.memory_space<vmem>>) attributes {dimension_semantics = [#tpu.dimension_semantics<parallel>, #tpu.dimension_semantics<parallel>, #tpu.dimension_semantics<arbitrary>], iteration_bounds = array<i64: 2, 1, 4>, scalar_prefetch = 0 : i64, scratch_operands = 1 : i64, tpu.core_type = #tpu.core_type<tc>, window_params = [{transform_indices = @transform_0, window_bounds = array<i64: 1, 8, 32>}, {pipeline_mode = #tpu.pipeline_mode<synchronous>, transform_indices = @transform_1, window_bounds = array<i64: 32, 64>}, {pipeline_mode = #tpu.pipeline_mode<synchronous>, transform_indices = @transform_2, window_bounds = array<i64: 1, 64>}, {transform_indices = @transform_3, window_bounds = array<i64: 1, 32, 4>}, {transform_indices = @transform_4, window_bounds = array<i64: 1, 2, 32>}, {transform_indices = @transform_5, window_bounds = array<i64: 1, 2, 32>}, {transform_indices = @transform_6, window_bounds = array<i64: 1, 1, 8, 32>}, {transform_indices = @transform_7, window_bounds = array<i64: 1, 1, 8, 32>}]} {
    %c0 = arith.constant 0 : index
    %c0_0 = arith.constant 0 : index
    %c0_1 = arith.constant 0 : index
    %0 = vector.load %arg3[%c0, %c0_0, %c0_1] : memref<1x8x32xf32, #tpu.memory_space<vmem>>, vector<1x8x32xf32>
    %1 = vector.shape_cast %0 : vector<1x8x32xf32> to vector<8x32xf32>
    %c0_i32 = arith.constant 0 : i32
    %2 = arith.cmpi eq, %arg2, %c0_i32 : i32
    %3 = arith.extui %2 : i1 to i32
    %c0_i32_2 = arith.constant 0 : i32
    %4 = arith.cmpi ne, %3, %c0_i32_2 : i32
    scf.if %4 {
      %c0_23 = arith.constant 0 : index
      %c0_24 = arith.constant 0 : index
      %52 = vector.load %arg4[%c0_23, %c0_24] : memref<32x64xf32, #tpu.memory_space<vmem>>, vector<32x64xf32>
      %cst_25 = arith.constant dense<0.000000e+00> : vector<8x64xf32>
      %53 = tpu.matmul %1, %52, %cst_25 {dimension_numbers = #tpu.dot_dimension_numbers<[1], [0], [0], [1], [0, 0, 1, 1], [], []>} : vector<8x32xf32>, vector<32x64xf32>, vector<8x64xf32> -> vector<8x64xf32>
      %c0_26 = arith.constant 0 : index
      %c0_27 = arith.constant 0 : index
      %54 = vector.load %arg5[%c0_26, %c0_27] : memref<1x64xf32, #tpu.memory_space<vmem>>, vector<1x64xf32>
      %55 = vector.broadcast %54 : vector<1x64xf32> to vector<8x64xf32>
      %56 = arith.addf %53, %55 : vector<8x64xf32>
      %c0_28 = arith.constant 0 : index
      %c0_29 = arith.constant 0 : index
      %57 = vector.load %arg11[%c0_28, %c0_29] : memref<8x64xf32, #tpu.memory_space<vmem>>, vector<8x64xf32>
      tpu.vector_store %arg11[%c0_28, %c0_29], %56 {strides = array<i32>} : memref<8x64xf32, #tpu.memory_space<vmem>>, vector<8x64xf32>,
    } else {
    }
    %c0_3 = arith.constant 0 : index
    %c0_4 = arith.constant 0 : index
    %c0_5 = arith.constant 0 : index
    %5 = vector.load %arg6[%c0_3, %c0_4, %c0_5] : memref<1x32x4xf32, #tpu.memory_space<vmem>>, vector<1x32x4xf32>
    %6 = vector.shape_cast %5 : vector<1x32x4xf32> to vector<32x4xf32>
    %cst = arith.constant dense<0.000000e+00> : vector<8x4xf32>
    %7 = tpu.matmul %1, %6, %cst {dimension_numbers = #tpu.dot_dimension_numbers<[1], [0], [0], [1], [0, 0, 1, 1], [], []>} : vector<8x32xf32>, vector<32x4xf32>, vector<8x4xf32> -> vector<8x4xf32>
    %c0_6 = arith.constant 0 : index
    %c0_7 = arith.constant 0 : index
    %c0_8 = arith.constant 0 : index
    %8 = vector.load %arg7[%c0_6, %c0_7, %c0_8] : memref<1x2x32xf32, #tpu.memory_space<vmem>>, vector<1x2x32xf32>
    %9 = vector.shape_cast %8 : vector<1x2x32xf32> to vector<2x32xf32>
    %c0_9 = arith.constant 0 : index
    %c0_10 = arith.constant 0 : index
    %c0_11 = arith.constant 0 : index
    %10 = vector.load %arg8[%c0_9, %c0_10, %c0_11] : memref<1x2x32xf32, #tpu.memory_space<vmem>>, vector<1x2x32xf32>
    %11 = vector.shape_cast %10 : vector<1x2x32xf32> to vector<2x32xf32>
    %12 = vector.extract_strided_slice %7 {offsets = [0, 0], sizes = [8, 1], strides = [1, 1]} : vector<8x4xf32> to vector<8x1xf32>
    %13 = vector.extract_strided_slice %9 {offsets = [0, 0], sizes = [1, 32], strides = [1, 1]} : vector<2x32xf32> to vector<1x32xf32>
    %14 = vector.shape_cast %13 : vector<1x32xf32> to vector<32xf32>
    %15 = vector.shape_cast %14 : vector<32xf32> to vector<1x32xf32>
    %16 = vector.broadcast %12 : vector<8x1xf32> to vector<8x32xf32>
    %17 = vector.broadcast %15 : vector<1x32xf32> to vector<8x32xf32>
    %18 = arith.mulf %16, %17 : vector<8x32xf32>
    %19 = vector.extract_strided_slice %7 {offsets = [0, 2], sizes = [8, 1], strides = [1, 1]} : vector<8x4xf32> to vector<8x1xf32>
    %20 = vector.extract_strided_slice %11 {offsets = [0, 0], sizes = [1, 32], strides = [1, 1]} : vector<2x32xf32> to vector<1x32xf32>
    %21 = vector.shape_cast %20 : vector<1x32xf32> to vector<32xf32>
    %22 = vector.shape_cast %21 : vector<32xf32> to vector<1x32xf32>
    %23 = vector.broadcast %19 : vector<8x1xf32> to vector<8x32xf32>
    %24 = vector.broadcast %22 : vector<1x32xf32> to vector<8x32xf32>
    %25 = arith.mulf %23, %24 : vector<8x32xf32>
    %26 = vector.extract_strided_slice %7 {offsets = [0, 1], sizes = [8, 1], strides = [1, 1]} : vector<8x4xf32> to vector<8x1xf32>
    %27 = vector.extract_strided_slice %9 {offsets = [1, 0], sizes = [1, 32], strides = [1, 1]} : vector<2x32xf32> to vector<1x32xf32>
    %28 = vector.shape_cast %27 : vector<1x32xf32> to vector<32xf32>
    %29 = vector.shape_cast %28 : vector<32xf32> to vector<1x32xf32>
    %30 = vector.broadcast %26 : vector<8x1xf32> to vector<8x32xf32>
    %31 = vector.broadcast %29 : vector<1x32xf32> to vector<8x32xf32>
    %32 = arith.mulf %30, %31 : vector<8x32xf32>
    %33 = arith.addf %18, %32 : vector<8x32xf32>
    %34 = vector.extract_strided_slice %7 {offsets = [0, 3], sizes = [8, 1], strides = [1, 1]} : vector<8x4xf32> to vector<8x1xf32>
    %35 = vector.extract_strided_slice %11 {offsets = [1, 0], sizes = [1, 32], strides = [1, 1]} : vector<2x32xf32> to vector<1x32xf32>
    %36 = vector.shape_cast %35 : vector<1x32xf32> to vector<32xf32>
    %37 = vector.shape_cast %36 : vector<32xf32> to vector<1x32xf32>
    %38 = vector.broadcast %34 : vector<8x1xf32> to vector<8x32xf32>
    %39 = vector.broadcast %37 : vector<1x32xf32> to vector<8x32xf32>
    %40 = arith.mulf %38, %39 : vector<8x32xf32>
    %41 = arith.addf %25, %40 : vector<8x32xf32>
    %c0_12 = arith.constant 0 : index
    %c0_13 = arith.constant 0 : index
    %42 = vector.load %arg11[%c0_12, %c0_13] : memref<8x64xf32, #tpu.memory_space<vmem>>, vector<8x32xf32>
    %43 = arith.addf %42, %33 : vector<8x32xf32>
    %c0_14 = arith.constant 0 : index
    %c0_15 = arith.constant 0 : index
    %c0_16 = arith.constant 0 : index
    %c0_17 = arith.constant 0 : index
    %44 = vector.load %arg9[%c0_14, %c0_15, %c0_16, %c0_17] : memref<1x1x8x32xf32, #tpu.memory_space<vmem>>, vector<1x1x8x32xf32>
    %45 = vector.shape_cast %44 : vector<1x1x8x32xf32> to vector<8x32xf32>
    %46 = vector.shape_cast %43 : vector<8x32xf32> to vector<1x1x8x32xf32>
    tpu.vector_store %arg9[%c0_14, %c0_15, %c0_16, %c0_17], %46 {strides = array<i32>} : memref<1x1x8x32xf32, #tpu.memory_space<vmem>>, vector<1x1x8x32xf32>,
    %c0_18 = arith.constant 0 : index
    %c32 = arith.constant 32 : index
    %47 = vector.load %arg11[%c0_18, %c32] : memref<8x64xf32, #tpu.memory_space<vmem>>, vector<8x32xf32>
    %48 = arith.addf %47, %41 : vector<8x32xf32>
    %c0_19 = arith.constant 0 : index
    %c0_20 = arith.constant 0 : index
    %c0_21 = arith.constant 0 : index
    %c0_22 = arith.constant 0 : index
    %49 = vector.load %arg10[%c0_19, %c0_20, %c0_21, %c0_22] : memref<1x1x8x32xf32, #tpu.memory_space<vmem>>, vector<1x1x8x32xf32>
    %50 = vector.shape_cast %49 : vector<1x1x8x32xf32> to vector<8x32xf32>
    %51 = vector.shape_cast %48 : vector<8x32xf32> to vector<1x1x8x32xf32>
    tpu.vector_store %arg10[%c0_19, %c0_20, %c0_21, %c0_22], %51 {strides = array<i32>} : memref<1x1x8x32xf32, #tpu.memory_space<vmem>>, vector<1x1x8x32xf32>,
    return
  }
  func.func @transform_0(%arg0: i32, %arg1: i32, %arg2: i32) -> (i32, i32, i32) {
    %c0_i32 = arith.constant 0 : i32
    %c0_i32_0 = arith.constant 0 : i32
    return %arg0, %arg1, %c0_i32 : i32, i32, i32
  }
  func.func @transform_1(%arg0: i32, %arg1: i32, %arg2: i32) -> (i32, i32) {
    %c0_i32 = arith.constant 0 : i32
    %c0_i32_0 = arith.constant 0 : i32
    %c0_i32_1 = arith.constant 0 : i32
    return %c0_i32, %c0_i32_0 : i32, i32
  }
  func.func @transform_2(%arg0: i32, %arg1: i32, %arg2: i32) -> (i32, i32) {
    %c0_i32 = arith.constant 0 : i32
    %c0_i32_0 = arith.constant 0 : i32
    %c0_i32_1 = arith.constant 0 : i32
    return %c0_i32, %c0_i32_0 : i32, i32
  }
  func.func @transform_3(%arg0: i32, %arg1: i32, %arg2: i32) -> (i32, i32, i32) {
    %c0_i32 = arith.constant 0 : i32
    %c0_i32_0 = arith.constant 0 : i32
    %c0_i32_1 = arith.constant 0 : i32
    return %arg2, %c0_i32, %c0_i32_0 : i32, i32, i32
  }
  func.func @transform_4(%arg0: i32, %arg1: i32, %arg2: i32) -> (i32, i32, i32) {
    %c0_i32 = arith.constant 0 : i32
    %c0_i32_0 = arith.constant 0 : i32
    %c0_i32_1 = arith.constant 0 : i32
    return %arg2, %c0_i32, %c0_i32_0 : i32, i32, i32
  }
  func.func @transform_5(%arg0: i32, %arg1: i32, %arg2: i32) -> (i32, i32, i32) {
    %c0_i32 = arith.constant 0 : i32
    %c0_i32_0 = arith.constant 0 : i32
    %c0_i32_1 = arith.constant 0 : i32
    return %arg2, %c0_i32, %c0_i32_0 : i32, i32, i32
  }
  func.func @transform_6(%arg0: i32, %arg1: i32, %arg2: i32) -> (i32, i32, i32, i32) {
    %c0_i32 = arith.constant 0 : i32
    %c0_i32_0 = arith.constant 0 : i32
    return %arg0, %arg2, %arg1, %c0_i32 : i32, i32, i32, i32
  }
  func.func @transform_7(%arg0: i32, %arg1: i32, %arg2: i32) -> (i32, i32, i32, i32) {
    %c0_i32 = arith.constant 0 : i32
    %c0_i32_0 = arith.constant 0 : i32
    return %arg0, %arg2, %arg1, %c0_i32 : i32, i32, i32, i32
  }
}

</mosaic_0001>

<bundles_post_ra>
// kernel: tpu_custom_call.1
= control target key start
LH: loop header
LB: loop body
LE: loop exit
PB: predicated region body
PF: predicated region fallthrough
CT: control target
= control target key end

     0   :  { %13 = vsyncpa [#allocation4], 0  ;;  %s1358_s0 = inlined_call_operand.vmem [shape: f32[2,8,32], index: 0, kind: input, shape index: {}]   ;;  %s1359_s1 = inlined_call_operand.vmem [shape: f32[32,64], index: 1, kind: input, shape index: {}]   ;;  %s1360_s2 = inlined_call_operand.vmem [shape: f32[1,64], index: 2, kind: input, shape index: {}]   ;;  %s1361_s3 = inlined_call_operand.vmem [shape: f32[4,32,4], index: 3, kind: input, shape index: {}]   ;;  %s1362_s4 = inlined_call_operand.vmem [shape: f32[4,2,32], index: 4, kind: input, shape index: {}]   ;;  %s1363_s5 = inlined_call_operand.vmem [shape: f32[4,2,32], index: 5, kind: input, shape index: {}]   ;;  %s1364_s6 = inlined_call_operand.hbm [shape: f32[2,4,8,32], index: 6, kind: output, shape index: {0}]   ;;  %s1365_s7 = inlined_call_operand.hbm [shape: f32[2,4,8,32], index: 7, kind: output, shape index: {1}]  }
   0x1   :  { %15 = vsyncpa [#allocation4 + $0x1], 0 }
   0x2   :  { %16 = vsyncpa [#allocation6], 0 }
   0x3   :  { %18 = vsyncpa [#allocation6 + $0x1], 0  ;;  %s1133_s24 = smov 0   ;;  %s1135_s25 = smov 0  }
   0x4   :  { %s1137_s26 = smov 0   ;;  %s1139_s27 = smov 0  }
   0x5   :  { %s1141_s28 = smov 0   ;;  %s1143_s29 = smov 0  }
   0x6   :  { %s1145_s30 = smov 0   ;;  %s1147_s8 = smov 0  }
   0x7 LB: > { %1373 = sst [smem:[#allocation9_spill]] %s1053_s25  ;;  %s790_s9 = sadd.s32 4294967295, %s1077_s8   ;;  %s1077_s8 = sphi %s1147_s8, %s24_s8   ;;  %s1073_s30 = sphi %s1145_s30, %s1390_s30   ;;  %s1069_s29 = sphi %s1143_s29, %s1389_s29   ;;  %s1065_s28 = sphi %s1141_s28, %s1388_s28   ;;  %s1061_s27 = sphi %s1139_s27, %s1387_s27   ;;  %s1057_s26 = sphi %s1137_s26, %s1386_s26   ;;  %s1053_s25 = sphi %s1135_s25, %s1385_s25   ;;  %s1049_s24 = sphi %s1133_s24, %s1384_s24  }
   0x8   : > { %1374 = sst [smem:[#allocation10_spill]] %s1057_s26  ;;  %s791_s10 = sadd.s32 4294967294, %s1077_s8  }
   0x9   : > { %1375 = sst [smem:[#allocation11_spill]] %s1069_s29  ;;  %s36_s11 = sadd.s32 1, %s1069_s29 }
   0xa   : > { %1376 = sst [smem:[#allocation12_spill]] %s1073_s30  ;;  %p37_p0 = scmp.ge.s32.totalorder %s36_s11, 4 }
   0xb   : > { %s43_s12 = sadd.s32 1, %s1073_s30  ;;  %p212_p1 = scmp.ne.s32.totalorder %s1057_s26, %s1053_s25 }
   0xc   : > { %p213_p2 = scmp.eq.s32.totalorder %s790_s9, 7  ;;  %s1392_s11 = smov (%p37_p0, %s36_s11), 0 }
   0xd   : > { %1377 = sst [smem:[#allocation13_spill]] %s1392_s11  ;;  %s1394_s12 = smov (!%p37_p0, %s43_s12), %s1073_s30 }
   0xe   : > { %s196_s13 = ssub.s32 %s1069_s29, %s1392_s11  ;;  %p1184_p3 = por %p213_p2, %p212_p1 }
   0xf   : > { %p45_p4 = scmp.ge.s32.totalorder %s1394_s12, 2  ;;  %p218_p5 = scmp.ne.s32.totalorder %s1053_s25, %s1049_s24 }
  0x10   : > { %p219_p6 = scmp.eq.s32.totalorder %s791_s10, 7  ;;  %p794_p7 = scmp.ge.s32.totalorder %s1077_s8, 1 }
  0x11   : > { %s1396_s12 = smov (%p45_p4, %s1394_s12), 0  ;;  %p305_p9 = scmp.lt.s32.totalorder %s1077_s8, 9 }
  0x12   : > { %1379 = sst [smem:[#allocation14_spill]] %s1396_s12  ;;  %p1193_p8 = por %p219_p6, %p218_p5 }
  0x13   : > { %s195_s16 = ssub.s32 %s1073_s30, %s1396_s12  ;;  %s202_s17 = sadd.s32 1, %s1057_s26 }
  0x14   : > { %s1380_s15 = scalar_select %p1193_p8, 1, 0 }
  0x15   : > { %s197_s18 = sor.u32 %s196_s13, %s195_s16  ;;  %p306_p10 = pnand %p794_p7, %p305_p9 }
  0x16   : > { %1381 = sst [smem:[#allocation15_spill]] %s1380_s15  ;;  %p200_p11 = scmp.eq.s32.totalorder %s197_s18, 0 }
  0x17   : > { %309 = sbr.rel (%p306_p10) target bundleno = 862 (0x35e), region = 44  ;;  %s1205_s20 = sand.u32 (!%p306_p10), 1, %s1053_s25  }
  0x18   : > { %s1202_s19 = scalar_select %p200_p11, %s1057_s26, %s202_s17  }
  0x19   : > { %p357_p12 = scmp.lt.s32.totalorder (!%p306_p10), %s1065_s28, 1  ;;  %s795_s21 = sshll.u32 (!%p306_p10), %s1205_s20, 3 }
  0x1a   : > { %1382 = sst [smem:[#allocation16_spill]] %s1202_s19  ;;  %p364_p13 = scmp.lt.s32.totalorder (!%p306_p10), %s1061_s27, 3 }
  0x1b   : > { %s1230_s10 = scalar_lea.vmem (!%p306_p10), [#allocation3], %s795_s21  ;;  %p802_p0 = scmp.ne.s32.totalorder (!%p306_p10), %s1061_s27, 0 }
  0x1e   : > { %s358_s22 = scalar_select %p357_p12, %s1065_s28, 1 }
  0x1f   : > { %s365_s23 = scalar_select %p364_p13, %s1061_s27, 3 }
  0x20   : > { %s797_s9 = sshll.u32 %s358_s22, 3  ;;  %381 = sbr.rel (%p802_p0) target bundleno = 257 (0x101), region = 48  ;;  %v382_v1 = vld [vmem:[%s1359_s1] sm:$0xff] (!%p802_p0)  ;;  %v383_v2 = vld [vmem:[%s1359_s1 + $0x8] sm:$0xff] (!%p802_p0)  ;;  %v384_v3 = vld [vmem:[%s1359_s1 + $0x10] sm:$0xff] (!%p802_p0)  ;;  %v1079_v4 = vmov (!%p802_p0), 0.0|0.0  }
  0x21   : > { %s363_s16 = scalar_lea.vmem %s1358_s0, %s797_s9  ;;  %s814_s17 = sshll.u32 %s365_s23, 5  ;;  %847 = vmatprep.subr.bf16.mxu0 (!%p802_p0), %v1079_v4  ;;  %v848_v5 = vpack.c.bf16 (!%p802_p0), %v383_v2, %v382_v1  ;;  %v385_v6 = vld [vmem:[%s1359_s1 + $0x18] sm:$0xff] (!%p802_p0)  ;;  %vm1080_vm0 = vmmov (!%p802_p0), 0   ;;  %v1081_v7 = vmov (!%p802_p0), 0.0   ;;  %vm393_vm1 = vcmask (!%p802_p0), 261120  }
  0x22   : > { %s1218_s11 = scalar_lea.vmem %s1361_s3, %s814_s17  ;;  %s800_s30 = sshll.u32 %s365_s23, 1  ;;  %v377_v0 = vld [vmem:[%s363_s16] sm:$0xff]  ;;  %833 = vmatprep.mubr.msk.f32.mxu0 (!%p802_p0), %vm1080_vm0, %v1081_v7  ;;  %v851_v8 = vpack.c.bf16 (!%p802_p0), %v385_v6, %v384_v3  ;;  %vm467_vm2 = vcmask (!%p802_p0), 523264  }
  0x23   : > { %s1223_s26 = scalar_lea.vmem %s1362_s4, %s800_s30  ;;  %s1228_s22 = scalar_lea.vmem %s1363_s5, %s800_s30  ;;  %849 = vmatpush3.bf16.msra.mxu0 (!%p802_p0), %v848_v5  ;;  %v803_v9 = vld [vmem:[%s1360_s2] ss:$0 sm:$0xff] (!%p802_p0) }
  0x24   : > { %s1232_s9 = scalar_lea.vmem [#allocation5], %s795_s21  ;;  %850 = vmatprep.subr.bf16.mxu0 (!%p802_p0), %v1079_v4 }
  0x27   : > { %852 = vmatpush3.bf16.msra.mxu0 %v851_v8 }
  0x2a   : > { %834 = vmatmul.mubr.msk.f32.vlgmr.msra.gmra.mrb[0].mxu0 %vm393_vm1, %v377_v0 }
  0xfd   : > { %v463_v10 = vpop.f32.mrb[0].mxu0 }
  0xfe   : > { %v464_v11 = vadd.f32 %v803_v9, %v463_v10  ;;  %v835_v12 = vpop.f32.mrb[1].mxu0 }
 0x100   : > { %468 = vst.msk [vmem:[#allocation2] sm:$0xff] %vm467_vm2, %v464_v11 }
 0x101 PF: > { %v469_v13 = vld [vmem:[%s1218_s11] sm:$0xff]  ;;  %v470_v14 = vld [vmem:[%s1218_s11 + $0x8] sm:$0xff]  ;;  %v471_v15 = vld [vmem:[%s1218_s11 + $0x10] sm:$0xff]  ;;  %v1082_v16 = vmov 0.0|0.0   ;;  %vm1083_vm3 = vmmov 0   ;;  %v1084_v19 = vmov 0.0   ;;  %v554_v26 = vlaneseq }
 0x102   : > { %853 = vmatprep.subr.bf16.mxu0 %v1082_v16  ;;  %v854_v17 = vpack.c.bf16 %v470_v14, %v469_v13  ;;  %v472_v18 = vld [vmem:[%s1218_s11 + $0x18] sm:$0xff]  ;;  %844 = vmatprep.mubr.msk.f32.mxu0 %vm1083_vm3, %v1084_v19  ;;  %v1085_v20 = vmov 2   ;;  %vm473_vm4 = vcmask 261120   ;;  %v1086_v24 = vmov 3   ;;  %v548_v30 = vld [vmem:[%s1228_s22] sm:$0x3] }
 0x103   : > { %947 = vset.pattern.permute.xlu0 %v1085_v20  ;;  %v857_v21 = vpack.c.bf16 %v472_v18, %v471_v15  ;;  %v1087_v25 = vmov 0   ;;  %v555_v27 = vshrl.u32 %v554_v26, 7  ;;  %s1088_s11 = smov 32   ;;  %v1089_v38 = vmov 1   ;;  %s1090_s17 = smov 96  }
 0x104   : > { %855 = vmatpush3.bf16.msra.mxu0 %v854_v17  ;;  %949 = vset.pattern.permute.xlu1 %v1087_v25  ;;  %v547_v42 = vld [vmem:[%s1223_s26] sm:$0x3]  ;;  %s808_s18 = sshll.u32 %s1065_s28, 2  ;;  %s624_s23 = sshll.u32 %s1230_s10, 4  ;;  %s1270_s23 = int_to_ptr.vmem [resolvable:$true] %s624_s23 }
 0x105   : > { %856 = vmatprep.subr.bf16.mxu0 %v1082_v16  ;;  %v556_v28 = vsub.s32 0, %v555_v27  ;;  %v574_v29 = vsub.s32 1, %v555_v27  ;;  %s1259_s22 = sadd.s32 %s1061_s27, %s808_s18  ;;  %s603_s27 = scalar_lea.sflag [#allocation4], %s1205_s20 }
 0x106   : > { %s809_s12 = sshll.u32 %s1259_s22, 7  ;;  %s951_s28 = scalar_lea.vmem %s1270_s23, 128 }
 0x107   : > { %v566_v32 = vrot.slane %v548_v30, %v556_v28  ;;  %v585_v33 = vrot.slane %v548_v30, %v574_v29  ;;  %v591_v39 = vld [vmem:[#allocation2] sm:$0xff]  ;;  %v557_v44 = vrot.slane %v547_v42, %v556_v28  ;;  %v575_v45 = vrot.slane %v547_v42, %v574_v29  ;;  %s1268_s29 = scalar_lea.hbm %s1364_s6, %s809_s12  ;;  %p952_p1 = scmp.ne.s32.totalorder %s1270_s23, %s951_s28 }
 0x108   : > { %858 = vmatpush3.bf16.msra.mxu0 %v857_v21  ;;  %s1091_s19 = smov [#allocation3]  }
 0x109   : > { %p953_p2 = pnand %p952_p1, %p1184_p3  ;;  %s955_s16 = sshll.u32 %s1091_s19, 4  ;;  %s956_s16 = int_to_ptr.vmem [resolvable:$false] %s955_s16 }
 0x10a   : > { %s957_s25 = scalar_lea.vmem %s956_s16, 256  ;;  %p958_p5 = scmp.lt.s32.totalorder %s1270_s23, %s956_s16 }
 0x10b   : > { %845 = vmatmul.mubr.msk.f32.vlgmr.msra.gmra.mrb[0].mxu0 %vm473_vm4, %v377_v0  ;;  %p954_p4 = pneg %p953_p2  ;;  %p959_p6 = scmp.lt.s32.totalorder %s957_s25, %s951_s28 }
 0x10d   : > { %p960_p7 = por %p959_p6, %p958_p5 }
 0x10f   : > { %p961_p9 = pnand %p960_p7, %p954_p4 }
 0x1de   : > { %v543_v22 = vpop.f32.mrb[0].mxu0 }
 0x1df   : > { %560 = vperm.xlu0 %947, %v543_v22   ;;  %v846_v23 = vpop.f32.mrb[1].mxu0 }
 0x1e3   : > { %948 = vset.pattern.permute.xlu0 %v1086_v24 }
 0x1e4   : > { %579 = vperm.xlu0 %948, %v543_v22  }
 0x25e   : > { %v561_v31 = vpop.permute.xlu0 %560 }
 0x25f   : > { %v567_v35 = vmul.f32 %v566_v32, %v561_v31 }
 0x263   : > { %v580_v34 = vpop.permute.xlu0 %579 }
 0x264   : > { %v586_v36 = vmul.f32 %v585_v33, %v580_v34 }
 0x266   : > { %v587_v37 = vadd.f32 %v586_v36, %v567_v35 }
 0x268   : > { %593 = vrot.lane.b32.xlu1 %v587_v37, %s1088_s11 }
 0x26c   : > { %551 = vperm.xlu1 %949, %v543_v22  }
 0x270   : > { %950 = vset.pattern.permute.xlu1 %v1089_v38 }
 0x271   : > { %569 = vperm.xlu1 %950, %v543_v22  }
 0x2da   : > { %v594_v40 = vpop.permute.xlu1 %593 }
 0x2db   : > { %v596_v41 = vadd.f32 %v594_v40, %v591_v39 }
 0x2dd   : > { %598 = vrot.lane.b32.xlu0 %v596_v41, %s1090_s17 }
 0x2eb   : > { %v552_v43 = vpop.permute.xlu1 %551 }
 0x2ec   : > { %v558_v47 = vmul.f32 %v557_v44, %v552_v43 }
 0x2f0   : > { %v570_v46 = vpop.permute.xlu1 %569 }
 0x2f1   : > { %v576_v48 = vmul.f32 %v575_v45, %v570_v46 }
 0x2f3   : > { %v577_v49 = vadd.f32 %v576_v48, %v558_v47 }
 0x2f5   : > { %v589_v50 = vadd.f32 %v591_v39, %v577_v49 }
 0x2f7   : > { %590 = vst.msk [vmem:[%s1230_s10] sm:$0xff] %vm473_vm4, %v589_v50 }
 0x2f8   : > { %964 = shalt.err (!%p961_p9)
}
 0x2f9   : > { %s965_s10 = scalar_lea.hbm %s1268_s29, 128  ;;  %s969_s21 = scalar_lea.hbm %s1364_s6, 1024 }
 0x2fa   : > { %p966_p10 = scmp.ne.s32.totalorder %s1268_s29, %s965_s10  ;;  %p970_p13 = scmp.lt.u32.totalorder %s1268_s29, %s1364_s6 }
 0x2fb   : > { %p971_p0 = scmp.lt.u32.totalorder %s969_s21, %s965_s10  ;;  %p973_p2 = scmp.lt.u32.totalorder %s965_s10, %s1268_s29 }
 0x2fc   : > { %p967_p11 = pnand %p966_p10, %p1184_p3 }
 0x2fd   : > { %p972_p1 = por %p971_p0, %p970_p13 }
 0x2fe   : > { %p968_p12 = pneg %p967_p11 }
 0x2ff   : > { %p974_p4 = por %p973_p2, %p972_p1 }
 0x301   : > { %p975_p5 = pnand %p974_p4, %p968_p12 }
 0x303   : > { %978 = shalt.err (!%p975_p5)
}
 0x304   : > { %859 = dma.vmem_to_hbm [thread:$0]  (%p1184_p3), %s1270_s23, 128, %s1268_s29, %s603_s27  }
 0x305   : > { %s640_s18 = sshll.u32 %s1232_s9, 4  ;;  %s1302_s28 = scalar_lea.hbm %s1365_s7, %s809_s12  ;;  %s1304_s18 = int_to_ptr.vmem [resolvable:$true] %s640_s18 }
 0x306   : > { %s608_s19 = scalar_lea.sflag [#allocation6], %s1205_s20  ;;  %s979_s16 = scalar_lea.vmem %s1304_s18, 128 }
 0x307   : > { %p980_p6 = scmp.ne.s32.totalorder %s1304_s18, %s979_s16  ;;  %s1092_s22 = smov [#allocation5]  }
 0x308   : > { %s983_s23 = sshll.u32 %s1092_s22, 4  ;;  %s984_s23 = int_to_ptr.vmem [resolvable:$false] %s983_s23 }
 0x309   : > { %p981_p7 = pnand %p980_p6, %p1184_p3  ;;  %s985_s29 = scalar_lea.vmem %s984_s23, 256 }
 0x30a   : > { %p986_p10 = scmp.lt.s32.totalorder %s1304_s18, %s984_s23  ;;  %p987_p11 = scmp.lt.s32.totalorder %s985_s29, %s979_s16 }
 0x30b   : > { %p982_p9 = pneg %p981_p7 }
 0x30c   : > { %p988_p12 = por %p987_p11, %p986_p10 }
 0x30e   : > { %p989_p13 = pnand %p988_p12, %p982_p9 }
 0x34f   : > { %v599_v51 = vpop.permute.xlu0 %598 }
 0x350   : > { %601 = vst.msk [vmem:[%s1232_s9] sm:$0xff] %vm473_vm4, %v599_v51 }
 0x351   : > { %992 = shalt.err (!%p989_p13)
}
 0x352   : > { %s993_s20 = scalar_lea.hbm %s1302_s28, 128  ;;  %s997_s27 = scalar_lea.hbm %s1365_s7, 1024 }
 0x353   : > { %p994_p0 = scmp.ne.s32.totalorder %s1302_s28, %s993_s20  ;;  %p998_p4 = scmp.lt.u32.totalorder %s1302_s28, %s1365_s7 }
 0x354   : > { %p999_p5 = scmp.lt.u32.totalorder %s997_s27, %s993_s20  ;;  %p1001_p7 = scmp.lt.u32.totalorder %s993_s20, %s1302_s28 }
 0x355   : > { %p995_p1 = pnand %p994_p0, %p1184_p3 }
 0x356   : > { %p1000_p6 = por %p999_p5, %p998_p4 }
 0x357   : > { %p996_p2 = pneg %p995_p1 }
 0x358   : > { %p1002_p9 = por %p1001_p7, %p1000_p6 }
 0x35a   : > { %p1003_p10 = pnand %p1002_p9, %p996_p2 }
 0x35c   : > { %1006 = shalt.err (!%p1003_p10)
}
 0x35d   : > { %860 = dma.vmem_to_hbm [thread:$0]  (%p1184_p3), %s1304_s18, 128, %s1302_s28, %s608_s19  }
 0x35e PF: > { %p870_p11 = scmp.ge.s32.totalorder %s1077_s8, 2  ;;  %s652_s15 = sand.u32 1, %s1049_s24  }
 0x35f   : > { %s653_s21 = scalar_lea.sflag [#allocation4], %s652_s15 }
 0x360   : > { %p864_p12 = pnand %p870_p11, %p1193_p8 }
 0x362   : > { %1040 = dma.done.wait (!%p864_p12), %s653_s21, 128  }
 0x363   : > { %1042 = vsyncadd (!%p864_p12), %s653_s21, 4294967168  ;;  %s662_s11 = scalar_lea.sflag [#allocation6], %s652_s15 }
 0x364   : > { %1044 = dma.done.wait (!%p864_p12), %s662_s11, 128  }
 0x365   : > { %1046 = vsyncadd (!%p864_p12), %s662_s11, 4294967168  ;;  %s24_s8 = sadd.s32 1, %s1077_s8   ;;  %s1384_s24 = sld [smem:[#allocation9_spill]] }
 0x366   : > { %p21_p13 = scmp.ge.s32.totalorder %s24_s8, 10   ;;  %s1385_s25 = sld [smem:[#allocation10_spill]] }
 0x367   : > { %s1386_s26 = sld [smem:[#allocation16_spill]]  ;;  %s1387_s27 = sld [smem:[#allocation11_spill]] }
 0x368   : > { %s1388_s28 = sld [smem:[#allocation12_spill]]  ;;  %s1389_s29 = sld [smem:[#allocation13_spill]] }
 0x369   : > { %s1390_s30 = sld [smem:[#allocation14_spill]]  ;;  %23 = sbr.rel (!%p21_p13) target bundleno = 7 (0x7), region = 109 }
 0x370   :  { %667 = vsyncpa [#allocation4], 1 }
 0x371   :  { %669 = vsyncpa [#allocation4 + $0x1], 1 }
 0x372   :  { %670 = vsyncpa [#allocation6], 1 }
 0x373   :  { %672 = vsyncpa [#allocation6 + $0x1], 1 }

</bundles_post_ra>
